<compile_context>
chip_gen: v7x
topology: tpu7x:2x2x1
jax: 0.10.0
libtpu: 0.0.40
codegen_flags: <defaults>
</compile_context>

<pallas_src>
import math

import jax
import jax.numpy as jnp
from jax.experimental import pallas as pl
from jax.experimental.pallas import tpu as pltpu

IN_FEATURES = 121          # fixed by the PyTorch module
LANE = 128                 # TPU lane width
LEAKY_SLOPE = 0.1
SOFTPLUS_THRESHOLD = 20.0  # PyTorch Softplus default (beta=1, threshold=20)


def _round_up(x, m):
    return (x + m - 1) // m * m


def _make_mlp_kernel(num_linear):
    """Kernel closure for a fixed number of Linear layers."""

    def kernel(x_ref, *refs):
        # refs = (w0, b0, w1, b1, ..., w_{L-1}, b_{L-1}, out_ref)
        out_ref = refs[-1]
        params = refs[:-1]
        h = x_ref[...]  # bf16 activations tile (TB, 128)
        for i in range(num_linear):
            w = params[2 * i][...]        # bf16 (K_pad, N_pad), VMEM-resident
            b = params[2 * i + 1][...]    # f32  (1, N_pad)
            # bf16 MXU operands, f32 accumulation.
            h = jnp.dot(h.astype(jnp.bfloat16), w,
                        preferred_element_type=jnp.float32) + b
            if i < num_linear - 1:
                # LeakyReLU(0.1); Dropout(0.25) is identity at inference.
                # TODO(synk): training-mode dropout (RNG mask) not implemented.
                h = jnp.maximum(h, LEAKY_SLOPE * h)
            else:
                # Softplus with PyTorch's numerical threshold (f32 on EUP).
                safe = jnp.minimum(h, SOFTPLUS_THRESHOLD)
                h = jnp.where(h > SOFTPLUS_THRESHOLD, h, jnp.log1p(jnp.exp(safe)))
        out_ref[...] = h.astype(out_ref.dtype)

    return kernel


def arb_free_dnn_forward(x, params, *, tile_batch=512):
    """params: flat list [w0, b0, ..., w_last, b_last] with w_i (in, out), b_i (1, out)."""
    num_linear = len(params) // 2
    batch = x.shape[0]

    # Feature dims of each layer boundary, padded to 128-lane multiples.
    dims = [params[2 * i].shape[0] for i in range(num_linear)] + [params[-2].shape[1]]
    pdims = [_round_up(d, LANE) for d in dims]

    # Zero-pad weights/biases; weights -> bf16 (MXU operands), biases -> f32.
    padded_params = []
    for i in range(num_linear):
        w, b = params[2 * i], params[2 * i + 1]
        kp, np_ = pdims[i], pdims[i + 1]
        wp = jnp.zeros((kp, np_), jnp.bfloat16)
        wp = wp.at[: w.shape[0], : w.shape[1]].set(w.astype(jnp.bfloat16))
        bp = jnp.zeros((1, np_), jnp.float32)
        bp = bp.at[:, : b.shape[1]].set(b.astype(jnp.float32))
        padded_params += [wp, bp]

    # Batch tiling: pad batch rows to a multiple of the tile (min 8 sublanes).
    tb = min(tile_batch, _round_up(batch, 8))
    pbatch = _round_up(batch, tb)

    # Pad input to (pbatch, 128) and cast to bf16 (halves activation DMA bytes;
    # numerically identical since the first dot casts to bf16 anyway).
    xp = jnp.zeros((pbatch, pdims[0]), jnp.bfloat16)
    xp = xp.at[:batch, : x.shape[1]].set(x.astype(jnp.bfloat16))

    grid = (pbatch // tb,)
    in_specs = [pl.BlockSpec((tb, pdims[0]), lambda i: (i, 0))]
    for li in range(num_linear):
        kp, np_ = pdims[li], pdims[li + 1]
        # Constant index_map: DMA'd once, resident across the whole grid.
        in_specs.append(pl.BlockSpec((kp, np_), lambda i: (0, 0)))
        in_specs.append(pl.BlockSpec((1, np_), lambda i: (0, 0)))
    out_spec = pl.BlockSpec((tb, pdims[-1]), lambda i: (i, 0))

    # Advisory cost estimate so XLA schedules the custom call sensibly.
    flops = 2 * pbatch * sum(pdims[i] * pdims[i + 1] for i in range(num_linear))
    transcendentals = 2 * pbatch * pdims[-1]  # exp + log1p per output element
    bytes_accessed = (
        xp.size * xp.dtype.itemsize
        + pbatch * pdims[-1] * 4
        + sum(p.size * p.dtype.itemsize for p in padded_params)
    )

    out = pl.pallas_call(
        _make_mlp_kernel(num_linear),
        out_shape=jax.ShapeDtypeStruct((pbatch, pdims[-1]), jnp.float32),
        grid=grid,
        in_specs=in_specs,
        out_specs=out_spec,
        compiler_params=pltpu.CompilerParams(dimension_semantics=("parallel",)),
        cost_estimate=pl.CostEstimate(
            flops=flops,
            transcendentals=transcendentals,
            bytes_accessed=bytes_accessed,
        ),
    )(xp, *padded_params)

    return out[:batch, :IN_FEATURES]


def init_params(key, layers):
    """Deterministic init mimicking nn.Linear's U(-1/sqrt(fan_in), 1/sqrt(fan_in))."""
    dims = [IN_FEATURES] + list(layers) + [IN_FEATURES]
    params = []
    for i in range(len(dims) - 1):
        fan_in, fan_out = dims[i], dims[i + 1]
        key, kw, kb = jax.random.split(key, 3)
        bound = 1.0 / math.sqrt(fan_in)
        w = jax.random.uniform(kw, (fan_in, fan_out), jnp.float32, -bound, bound)
        b = jax.random.uniform(kb, (1, fan_out), jnp.float32, -bound, bound)
        params += [w, b]
    return params


def reference_forward(x, params):
    """Pure-JAX reference with the same bf16-operand / f32-accumulate numerics."""
    num_linear = len(params) // 2
    h = x.astype(jnp.float32)
    for i in range(num_linear):
        w, b = params[2 * i], params[2 * i + 1]
        h = jnp.dot(h.astype(jnp.bfloat16), w.astype(jnp.bfloat16),
                    preferred_element_type=jnp.float32) + b.astype(jnp.float32)
        if i < num_linear - 1:
            h = jnp.maximum(h, LEAKY_SLOPE * h)
        else:
            h = jnp.where(
                h > SOFTPLUS_THRESHOLD,
                h,
                jnp.log1p(jnp.exp(jnp.minimum(h, SOFTPLUS_THRESHOLD))),
            )
    return h


if __name__ == "__main__":
    layers = [32, 64]  # hidden layer sizes passed to ArbFreeDNN(layers)
    batch = 8

    key = jax.random.PRNGKey(0)
    key, kx = jax.random.split(key)
    x = jax.random.normal(kx, (batch, IN_FEATURES), jnp.float32)
    params = init_params(key, layers)

    out = jax.block_until_ready(arb_free_dnn_forward(x, params))
    ref = reference_forward(x, params)

    assert out.shape == (batch, IN_FEATURES)
    assert bool(jnp.all(jnp.isfinite(out))), "non-finite output"
    assert jnp.allclose(out, ref, atol=1e-2, rtol=1e-2), "mismatch vs reference"

    print("KERNEL_OK")
</pallas_src>

<mosaic_0001>
module attributes {stable_mosaic.version = 11 : i64} {
  func.func @kernel(%arg0: i32, %arg1: memref<8x128xbf16, #tpu.memory_space<vmem>>, %arg2: memref<128x128xbf16, #tpu.memory_space<vmem>>, %arg3: memref<1x128xf32, #tpu.memory_space<vmem>>, %arg4: memref<128x128xbf16, #tpu.memory_space<vmem>>, %arg5: memref<1x128xf32, #tpu.memory_space<vmem>>, %arg6: memref<128x128xbf16, #tpu.memory_space<vmem>>, %arg7: memref<1x128xf32, #tpu.memory_space<vmem>>, %arg8: memref<8x128xf32, #tpu.memory_space<vmem>>) attributes {dimension_semantics = [#tpu.dimension_semantics<parallel>], iteration_bounds = array<i64: 1>, scalar_prefetch = 0 : i64, scratch_operands = 0 : i64, tpu.core_type = #tpu.core_type<tc>, window_params = [{transform_indices = @transform_0, window_bounds = array<i64: 8, 128>}, {pipeline_mode = #tpu.pipeline_mode<synchronous>, transform_indices = @transform_1, window_bounds = array<i64: 128, 128>}, {pipeline_mode = #tpu.pipeline_mode<synchronous>, transform_indices = @transform_2, window_bounds = array<i64: 1, 128>}, {pipeline_mode = #tpu.pipeline_mode<synchronous>, transform_indices = @transform_3, window_bounds = array<i64: 128, 128>}, {pipeline_mode = #tpu.pipeline_mode<synchronous>, transform_indices = @transform_4, window_bounds = array<i64: 1, 128>}, {pipeline_mode = #tpu.pipeline_mode<synchronous>, transform_indices = @transform_5, window_bounds = array<i64: 128, 128>}, {pipeline_mode = #tpu.pipeline_mode<synchronous>, transform_indices = @transform_6, window_bounds = array<i64: 1, 128>}, {transform_indices = @transform_7, window_bounds = array<i64: 8, 128>}]} {
    %c0 = arith.constant 0 : index
    %c0_0 = arith.constant 0 : index
    %0 = vector.load %arg1[%c0, %c0_0] : memref<8x128xbf16, #tpu.memory_space<vmem>>, vector<8x128xbf16>
    %c0_1 = arith.constant 0 : index
    %c0_2 = arith.constant 0 : index
    %1 = vector.load %arg2[%c0_1, %c0_2] : memref<128x128xbf16, #tpu.memory_space<vmem>>, vector<128x128xbf16>
    %c0_3 = arith.constant 0 : index
    %c0_4 = arith.constant 0 : index
    %2 = vector.load %arg3[%c0_3, %c0_4] : memref<1x128xf32, #tpu.memory_space<vmem>>, vector<1x128xf32>
    %cst = arith.constant dense<0.000000e+00> : vector<8x128xf32>
    %3 = tpu.matmul %0, %1, %cst {dimension_numbers = #tpu.dot_dimension_numbers<[1], [0], [0], [1], [0, 0, 1, 1], [], []>} : vector<8x128xbf16>, vector<128x128xbf16>, vector<8x128xf32> -> vector<8x128xf32>
    %4 = vector.broadcast %2 : vector<1x128xf32> to vector<8x128xf32>
    %5 = arith.addf %3, %4 : vector<8x128xf32>
    %cst_5 = arith.constant 1.000000e-01 : f32
    %6 = vector.broadcast %cst_5 : f32 to vector<8x128xf32>
    %7 = arith.mulf %6, %5 : vector<8x128xf32>
    %8 = arith.maximumf %5, %7 : vector<8x128xf32>
    %c0_6 = arith.constant 0 : index
    %c0_7 = arith.constant 0 : index
    %9 = vector.load %arg4[%c0_6, %c0_7] : memref<128x128xbf16, #tpu.memory_space<vmem>>, vector<128x128xbf16>
    %c0_8 = arith.constant 0 : index
    %c0_9 = arith.constant 0 : index
    %10 = vector.load %arg5[%c0_8, %c0_9] : memref<1x128xf32, #tpu.memory_space<vmem>>, vector<1x128xf32>
    %11 = arith.truncf %8 : vector<8x128xf32> to vector<8x128xbf16>
    %cst_10 = arith.constant dense<0.000000e+00> : vector<8x128xf32>
    %12 = tpu.matmul %11, %9, %cst_10 {dimension_numbers = #tpu.dot_dimension_numbers<[1], [0], [0], [1], [0, 0, 1, 1], [], []>} : vector<8x128xbf16>, vector<128x128xbf16>, vector<8x128xf32> -> vector<8x128xf32>
    %13 = vector.broadcast %10 : vector<1x128xf32> to vector<8x128xf32>
    %14 = arith.addf %12, %13 : vector<8x128xf32>
    %cst_11 = arith.constant 1.000000e-01 : f32
    %15 = vector.broadcast %cst_11 : f32 to vector<8x128xf32>
    %16 = arith.mulf %15, %14 : vector<8x128xf32>
    %17 = arith.maximumf %14, %16 : vector<8x128xf32>
    %c0_12 = arith.constant 0 : index
    %c0_13 = arith.constant 0 : index
    %18 = vector.load %arg6[%c0_12, %c0_13] : memref<128x128xbf16, #tpu.memory_space<vmem>>, vector<128x128xbf16>
    %c0_14 = arith.constant 0 : index
    %c0_15 = arith.constant 0 : index
    %19 = vector.load %arg7[%c0_14, %c0_15] : memref<1x128xf32, #tpu.memory_space<vmem>>, vector<1x128xf32>
    %20 = arith.truncf %17 : vector<8x128xf32> to vector<8x128xbf16>
    %cst_16 = arith.constant dense<0.000000e+00> : vector<8x128xf32>
    %21 = tpu.matmul %20, %18, %cst_16 {dimension_numbers = #tpu.dot_dimension_numbers<[1], [0], [0], [1], [0, 0, 1, 1], [], []>} : vector<8x128xbf16>, vector<128x128xbf16>, vector<8x128xf32> -> vector<8x128xf32>
    %22 = vector.broadcast %19 : vector<1x128xf32> to vector<8x128xf32>
    %23 = arith.addf %21, %22 : vector<8x128xf32>
    %cst_17 = arith.constant 2.000000e+01 : f32
    %24 = vector.broadcast %cst_17 : f32 to vector<8x128xf32>
    %25 = arith.minimumf %23, %24 : vector<8x128xf32>
    %cst_18 = arith.constant 2.000000e+01 : f32
    %26 = vector.broadcast %cst_18 : f32 to vector<8x128xf32>
    %27 = arith.cmpf ogt, %23, %26 : vector<8x128xf32>
    %28 = math.exp %25 : vector<8x128xf32>
    %29 = math.log1p %28 : vector<8x128xf32>
    %30 = arith.select %27, %23, %29 : vector<8x128xi1>, vector<8x128xf32>
    %c0_19 = arith.constant 0 : index
    %c0_20 = arith.constant 0 : index
    %31 = vector.load %arg8[%c0_19, %c0_20] : memref<8x128xf32, #tpu.memory_space<vmem>>, vector<8x128xf32>
    tpu.vector_store %arg8[%c0_19, %c0_20], %30 {strides = array<i32>} : memref<8x128xf32, #tpu.memory_space<vmem>>, vector<8x128xf32>,
    return
  }
  func.func @transform_0(%arg0: i32) -> (i32, i32) {
    %c0_i32 = arith.constant 0 : i32
    %c0_i32_0 = arith.constant 0 : i32
    return %arg0, %c0_i32 : i32, i32
  }
  func.func @transform_1(%arg0: i32) -> (i32, i32) {
    %c0_i32 = arith.constant 0 : i32
    %c0_i32_0 = arith.constant 0 : i32
    %c0_i32_1 = arith.constant 0 : i32
    return %c0_i32, %c0_i32_0 : i32, i32
  }
  func.func @transform_2(%arg0: i32) -> (i32, i32) {
    %c0_i32 = arith.constant 0 : i32
    %c0_i32_0 = arith.constant 0 : i32
    %c0_i32_1 = arith.constant 0 : i32
    return %c0_i32, %c0_i32_0 : i32, i32
  }
  func.func @transform_3(%arg0: i32) -> (i32, i32) {
    %c0_i32 = arith.constant 0 : i32
    %c0_i32_0 = arith.constant 0 : i32
    %c0_i32_1 = arith.constant 0 : i32
    return %c0_i32, %c0_i32_0 : i32, i32
  }
  func.func @transform_4(%arg0: i32) -> (i32, i32) {
    %c0_i32 = arith.constant 0 : i32
    %c0_i32_0 = arith.constant 0 : i32
    %c0_i32_1 = arith.constant 0 : i32
    return %c0_i32, %c0_i32_0 : i32, i32
  }
  func.func @transform_5(%arg0: i32) -> (i32, i32) {
    %c0_i32 = arith.constant 0 : i32
    %c0_i32_0 = arith.constant 0 : i32
    %c0_i32_1 = arith.constant 0 : i32
    return %c0_i32, %c0_i32_0 : i32, i32
  }
  func.func @transform_6(%arg0: i32) -> (i32, i32) {
    %c0_i32 = arith.constant 0 : i32
    %c0_i32_0 = arith.constant 0 : i32
    %c0_i32_1 = arith.constant 0 : i32
    return %c0_i32, %c0_i32_0 : i32, i32
  }
  func.func @transform_7(%arg0: i32) -> (i32, i32) {
    %c0_i32 = arith.constant 0 : i32
    %c0_i32_0 = arith.constant 0 : i32
    return %arg0, %c0_i32 : i32, i32
  }
}

</mosaic_0001>

<bundles_post_ra>
// kernel: tpu_custom_call.1
= control target key start
LH: loop header
LB: loop body
LE: loop exit
PB: predicated region body
PF: predicated region fallthrough
CT: control target
= control target key end

     0   :  { %12 = vsyncpa [#allocation3], 0  ;;  %s879_s0 = inlined_call_operand.hbm [shape: bf16[8,128], index: 0, kind: input, shape index: {}]   ;;  %s880_s1 = inlined_call_operand.hbm [shape: bf16[128,128], index: 1, kind: input, shape index: {}]   ;;  %s881_s2 = inlined_call_operand.vmem [shape: f32[1,128], index: 2, kind: input, shape index: {}]   ;;  %s882_s3 = inlined_call_operand.hbm [shape: bf16[128,128], index: 3, kind: input, shape index: {}]   ;;  %s883_s4 = inlined_call_operand.vmem [shape: f32[1,128], index: 4, kind: input, shape index: {}]   ;;  %s884_s5 = inlined_call_operand.hbm [shape: bf16[128,128], index: 5, kind: input, shape index: {}]   ;;  %s885_s6 = inlined_call_operand.vmem [shape: f32[1,128], index: 6, kind: input, shape index: {}]   ;;  %s886_s7 = inlined_call_operand.hbm [shape: f32[8,128], index: 7, kind: output, shape index: {}]  }
   0x1   :  { %13 = vsyncpa [#allocation6], 0 }
   0x2   :  { %14 = vsyncpa [#allocation9], 0 }
   0x3   :  { %15 = vsyncpa [#allocation4], 0  ;;  %s722_s24 = smov [#allocation5]   ;;  %s604_s28 = scalar_lea.hbm %s880_s1, 1024 }
   0x4   :  { %s31_s25 = sshll.u32 %s722_s24, 4  ;;  %p605_p0 = scmp.ne.s32.totalorder %s880_s1, %s604_s28  ;;  %s32_s25 = int_to_ptr.vmem [resolvable:$true] %s31_s25 }
   0x5   :  { %p608_p1 = scmp.lt.u32.totalorder %s604_s28, %s880_s1 }
   0x7   :  { %p610_p2 = pnand %p608_p1, %p605_p0 }
   0x9   :  { %613 = shalt.err (!%p610_p2)
}
   0xa   :  { %s614_s10 = scalar_lea.vmem %s32_s25, 1024  ;;  %p619_p4 = scmp.lt.s32.totalorder %s32_s25, %s32_s25 }
   0xb   :  { %p615_p3 = scmp.ne.s32.totalorder %s32_s25, %s614_s10  ;;  %p620_p5 = scmp.lt.s32.totalorder %s614_s10, %s614_s10 }
   0xd   :  { %p621_p6 = por %p620_p5, %p619_p4 }
   0xf   :  { %p622_p7 = pnand %p621_p6, %p615_p3 }
  0x11   :  { %625 = shalt.err (!%p622_p7)
}
  0x12   :  { %s723_s11 = smov 64   ;;  %s724_s12 = smov 4  }
  0x13   :  { %37 = dma.hbm_to_vmem [thread:$0]  %s880_s1, 1024, %s32_s25, [#allocation6], %s723_s11, %s723_s11, %s724_s12  }
  0x14   :  { %s725_s15 = smov [#allocation2]   ;;  %s726_s17 = smov [#allocation7]  }
  0x15   :  { %s22_s16 = sshll.u32 %s725_s15, 4  ;;  %s45_s18 = sshll.u32 %s726_s17, 4  ;;  %s23_s16 = int_to_ptr.vmem [resolvable:$true] %s22_s16  ;;  %s46_s18 = int_to_ptr.vmem [resolvable:$true] %s45_s18 }
  0x16   :  { %s626_s21 = scalar_lea.hbm %s879_s0, 64 }
  0x17   :  { %p627_p8 = scmp.ne.s32.totalorder %s879_s0, %s626_s21  ;;  %p630_p9 = scmp.lt.u32.totalorder %s626_s21, %s879_s0 }
  0x19   :  { %p632_p10 = pnand %p630_p9, %p627_p8 }
  0x1b   :  { %635 = shalt.err (!%p632_p10)
}
  0x1c   :  { %s636_s1 = scalar_lea.vmem %s23_s16, 64  ;;  %p641_p12 = scmp.lt.s32.totalorder %s23_s16, %s23_s16 }
  0x1d   :  { %p637_p11 = scmp.ne.s32.totalorder %s23_s16, %s636_s1  ;;  %p642_p13 = scmp.lt.s32.totalorder %s636_s1, %s636_s1 }
  0x1f   :  { %p643_p0 = por %p642_p13, %p641_p12 }
  0x21   :  { %p644_p1 = pnand %p643_p0, %p637_p11 }
  0x23   :  { %647 = shalt.err (!%p644_p1)
}
  0x24   :  { %25 = dma.hbm_to_vmem [thread:$0]  %s879_s0, 64, %s23_s16, [#allocation3]  }
  0x25   :  { %s648_s30 = scalar_lea.hbm %s882_s3, 1024 }
  0x26   :  { %p649_p2 = scmp.ne.s32.totalorder %s882_s3, %s648_s30  ;;  %p652_p3 = scmp.lt.u32.totalorder %s648_s30, %s882_s3 }
  0x28   :  { %p654_p4 = pnand %p652_p3, %p649_p2 }
  0x2a   :  { %657 = shalt.err (!%p654_p4)
}
  0x2b   :  { %s658_s14 = scalar_lea.vmem %s46_s18, 1024  ;;  %p663_p6 = scmp.lt.s32.totalorder %s46_s18, %s46_s18 }
  0x2c   :  { %p659_p5 = scmp.ne.s32.totalorder %s46_s18, %s658_s14  ;;  %p664_p7 = scmp.lt.s32.totalorder %s658_s14, %s658_s14 }
  0x2e   :  { %p665_p8 = por %p664_p7, %p663_p6 }
  0x30   :  { %p666_p9 = pnand %p665_p8, %p659_p5 }
  0x32   :  { %669 = shalt.err (!%p666_p9)
}
  0x33   :  { %51 = dma.hbm_to_vmem [thread:$0]  %s882_s3, 1024, %s46_s18, [#allocation6], %s723_s11, %s723_s11, %s724_s12  }
  0x34   :  { %s727_s16 = smov [#allocation8]   ;;  %s670_s21 = scalar_lea.hbm %s884_s5, 1024 }
  0x35   :  { %s59_s17 = sshll.u32 %s727_s16, 4  ;;  %p671_p10 = scmp.ne.s32.totalorder %s884_s5, %s670_s21  ;;  %s60_s17 = int_to_ptr.vmem [resolvable:$true] %s59_s17 }
  0x36   :  { %p674_p11 = scmp.lt.u32.totalorder %s670_s21, %s884_s5 }
  0x38   :  { %p676_p12 = pnand %p674_p11, %p671_p10 }
  0x3a   :  { %679 = shalt.err (!%p676_p12)
}
  0x3b   :  { %s680_s1 = scalar_lea.vmem %s60_s17, 1024  ;;  %p685_p0 = scmp.lt.s32.totalorder %s60_s17, %s60_s17 }
  0x3c   :  { %p681_p13 = scmp.ne.s32.totalorder %s60_s17, %s680_s1  ;;  %p686_p1 = scmp.lt.s32.totalorder %s680_s1, %s680_s1 }
  0x3e   :  { %p687_p2 = por %p686_p1, %p685_p0 }
  0x40   :  { %p688_p3 = pnand %p687_p2, %p681_p13 }
  0x42   :  { %691 = shalt.err (!%p688_p3)
}
  0x43   :  { %65 = dma.hbm_to_vmem [thread:$0]  %s884_s5, 1024, %s60_s17, [#allocation9], %s723_s11, %s723_s11, %s724_s12  }
  0x44   :  { %714 = dma.done.wait [#allocation3], 64  }
  0x45   :  { %715 = vsyncadd [#allocation3], 4294967232 }
  0x46   :  { %716 = dma.done.wait [#allocation6], 2048  }
  0x47   :  { %717 = vsyncadd [#allocation6], 4294965248 }
  0x48   :  { %718 = dma.done.wait [#allocation9], 1024  }
  0x49   :  { %719 = vsyncadd [#allocation9], 4294966272  ;;  %v728_v0 = vmov 0.0   ;;  %vm729_vm0 = vmmov 0   ;;  %v576_v1 = vld [vmem:[#allocation5] sm:$0xff]   ;;  %v577_v2 = vld [vmem:[#allocation5 + $0x8] sm:$0xff]  }
  0x4a   :  { %507 = vmatprep.subr.bf16.mxu0 %v728_v0  ;;  %523 = vmatprep.mubr.msk.bf16.mxu0 %vm729_vm0, %v728_v0  ;;  %v578_v3 = vld [vmem:[#allocation5 + $0x10] sm:$0xff]   ;;  %v584_v4 = vld [vmem:[#allocation7] sm:$0xff]   ;;  %v579_v5 = vld [vmem:[#allocation5 + $0x18] sm:$0xff]  }
  0x4b   :  { %527 = vmatprep.subr.bf16.mxu1 %v728_v0  ;;  %543 = vmatprep.mubr.msk.bf16.mxu1 %vm729_vm0, %v728_v0  ;;  %v585_v6 = vld [vmem:[#allocation7 + $0x8] sm:$0xff]   ;;  %v580_v7 = vld [vmem:[#allocation5 + $0x20] sm:$0xff]   ;;  %v586_v8 = vld [vmem:[#allocation7 + $0x10] sm:$0xff]  }
  0x4c   :  { %508 = vmatpush3.bf16.msra.mxu0 %v576_v1  ;;  %528 = vmatpush3.bf16.msra.mxu1 %v584_v4  ;;  %v581_v9 = vld [vmem:[#allocation5 + $0x28] sm:$0xff]   ;;  %v587_v10 = vld [vmem:[#allocation7 + $0x18] sm:$0xff]   ;;  %v582_v11 = vld [vmem:[#allocation5 + $0x30] sm:$0xff]  }
  0x4d   :  { %509 = vmatprep.subr.bf16.mxu0 %v728_v0  ;;  %529 = vmatprep.subr.bf16.mxu1 %v728_v0  ;;  %v588_v12 = vld [vmem:[#allocation7 + $0x20] sm:$0xff]   ;;  %v583_v13 = vld [vmem:[#allocation5 + $0x38] sm:$0xff]   ;;  %v589_v14 = vld [vmem:[#allocation7 + $0x28] sm:$0xff]  }
  0x4e   :  { %v81_v15 = vld [vmem:[#allocation2] sm:$0xf]  ;;  %v590_v16 = vld [vmem:[#allocation7 + $0x30] sm:$0xff]   ;;  %v592_v18 = vld [vmem:[#allocation8] sm:$0xff]  }
  0x4f   :  { %v591_v17 = vld [vmem:[#allocation7 + $0x38] sm:$0xff]   ;;  %v593_v19 = vld [vmem:[#allocation8 + $0x8] sm:$0xff]   ;;  %v594_v20 = vld [vmem:[#allocation8 + $0x10] sm:$0xff]  }
  0x50   :  { %510 = vmatpush3.bf16.msra.mxu0 %v577_v2  ;;  %530 = vmatpush3.bf16.msra.mxu1 %v585_v6  ;;  %v595_v21 = vld [vmem:[#allocation8 + $0x18] sm:$0xff]   ;;  %v596_v22 = vld [vmem:[#allocation8 + $0x20] sm:$0xff]   ;;  %v597_v23 = vld [vmem:[#allocation8 + $0x28] sm:$0xff]  }
  0x51   :  { %511 = vmatprep.subr.bf16.mxu0 %v728_v0  ;;  %531 = vmatprep.subr.bf16.mxu1 %v728_v0  ;;  %v453_v24 = vld [vmem:[%s881_s2] ss:$0 sm:$0xff]  ;;  %v598_v33 = vld [vmem:[#allocation8 + $0x30] sm:$0xff]  }
  0x52   :  { %v599_v34 = vld [vmem:[#allocation8 + $0x38] sm:$0xff]  }
  0x53   :  { %v462_v35 = vld [vmem:[%s883_s4] ss:$0 sm:$0xff]  ;;  %s730_s4 = smov [#allocation10]  }
  0x54   :  { %512 = vmatpush3.bf16.msra.mxu0 %v578_v3  ;;  %532 = vmatpush3.bf16.msra.mxu1 %v586_v8  ;;  %v471_v44 = vld [vmem:[%s885_s6] ss:$0 sm:$0xff]  ;;  %s442_s28 = sshll.u32 %s730_s4, 4  ;;  %s443_s28 = int_to_ptr.vmem [resolvable:$true] %s442_s28 }
  0x55   :  { %513 = vmatprep.subr.bf16.mxu0 %v728_v0  ;;  %533 = vmatprep.subr.bf16.mxu1 %v728_v0  ;;  %s692_s6 = scalar_lea.vmem %s443_s28, 128  ;;  %p697_p5 = scmp.lt.s32.totalorder %s443_s28, %s443_s28 }
  0x56   :  { %p693_p4 = scmp.ne.s32.totalorder %s443_s28, %s692_s6  ;;  %p698_p6 = scmp.lt.s32.totalorder %s692_s6, %s692_s6 }
  0x58   :  { %514 = vmatpush3.bf16.msra.mxu0 %v579_v5  ;;  %534 = vmatpush3.bf16.msra.mxu1 %v587_v10  ;;  %p699_p7 = por %p698_p6, %p697_p5 }
  0x59   :  { %515 = vmatprep.subr.bf16.mxu0 %v728_v0  ;;  %535 = vmatprep.subr.bf16.mxu1 %v728_v0 }
  0x5a   :  { %p700_p8 = pnand %p699_p7, %p693_p4 }
  0x5c   :  { %516 = vmatpush3.bf16.msra.mxu0 %v580_v7  ;;  %536 = vmatpush3.bf16.msra.mxu1 %v588_v12 }
  0x5d   :  { %517 = vmatprep.subr.bf16.mxu0 %v728_v0  ;;  %537 = vmatprep.subr.bf16.mxu1 %v728_v0 }
  0x60   :  { %518 = vmatpush3.bf16.msra.mxu0 %v581_v9  ;;  %538 = vmatpush3.bf16.msra.mxu1 %v589_v14 }
  0x61   :  { %519 = vmatprep.subr.bf16.mxu0 %v728_v0  ;;  %539 = vmatprep.subr.bf16.mxu1 %v728_v0 }
  0x64   :  { %520 = vmatpush3.bf16.msra.mxu0 %v582_v11  ;;  %540 = vmatpush3.bf16.msra.mxu1 %v590_v16 }
  0x65   :  { %521 = vmatprep.subr.bf16.mxu0 %v728_v0  ;;  %541 = vmatprep.subr.bf16.mxu1 %v728_v0 }
  0x68   :  { %522 = vmatpush3.bf16.msra.mxu0 %v583_v13  ;;  %542 = vmatpush3.bf16.msra.mxu1 %v591_v17 }
  0x69   :  { %547 = vmatprep.subr.bf16.mxu0 %v728_v0 }
  0x6b   :  { %524 = vmatmul.mubr.bf16.vlgmr.msra.gmra.mrb[0].mxu0 %v81_v15 }
  0x6c   :  { %563 = vmatprep.mubr.msk.bf16.mxu0 %vm729_vm0, %v728_v0  ;;  %548 = vmatpush3.bf16.msra.mxu0 %v592_v18 }
  0x6d   :  { %549 = vmatprep.subr.bf16.mxu0 %v728_v0 }
  0x70   :  { %550 = vmatpush3.bf16.msra.mxu0 %v593_v19 }
  0x71   :  { %551 = vmatprep.subr.bf16.mxu0 %v728_v0 }
  0x74   :  { %552 = vmatpush3.bf16.msra.mxu0 %v594_v20 }
  0x75   :  { %553 = vmatprep.subr.bf16.mxu0 %v728_v0 }
  0x78   :  { %554 = vmatpush3.bf16.msra.mxu0 %v595_v21 }
  0x79   :  { %555 = vmatprep.subr.bf16.mxu0 %v728_v0 }
  0x7c   :  { %556 = vmatpush3.bf16.msra.mxu0 %v596_v22 }
  0x7d   :  { %557 = vmatprep.subr.bf16.mxu0 %v728_v0 }
  0x80   :  { %558 = vmatpush3.bf16.msra.mxu0 %v597_v23 }
  0x81   :  { %559 = vmatprep.subr.bf16.mxu0 %v728_v0 }
  0x84   :  { %560 = vmatpush3.bf16.msra.mxu0 %v598_v33 }
  0x85   :  { %561 = vmatprep.subr.bf16.mxu0 %v728_v0 }
  0x88   :  { %562 = vmatpush3.bf16.msra.mxu0 %v599_v34 }
 0x13e   :  { %v187_v25 = vpop.f32.mrb[0].mxu0 }
 0x13f   :  { %v188_v26 = vadd.f32 %v453_v24, %v187_v25  ;;  %v525_v27 = vpop.f32.mrb[1].mxu0 }
 0x140   :  { %v190_v28 = vpop.f32.mrb[2].mxu0 }
 0x141   :  { %v193_v29 = vmul.f32 0.1, %v188_v26  ;;  %v526_v30 = vpop.f32.mrb[3].mxu0 }
 0x143   :  { %v194_v31 = vmax.f32 %v188_v26, %v193_v29 }
 0x145   :  { %v212_v32 = vpack.c.bf16 %v194_v31, %v194_v31 }
 0x147   :  { %544 = vmatmul.mubr.bf16.vlgmr.msra.gmra.mrb[0].mxu1 %v212_v32 }
 0x21a   :  { %v301_v36 = vpop.f32.mrb[0].mxu1 }
 0x21b   :  { %v302_v37 = vadd.f32 %v462_v35, %v301_v36  ;;  %v545_v38 = vpop.f32.mrb[1].mxu1 }
 0x21c   :  { %v304_v39 = vpop.f32.mrb[2].mxu1 }
 0x21d   :  { %v307_v40 = vmul.f32 0.1, %v302_v37  ;;  %v546_v41 = vpop.f32.mrb[3].mxu1 }
 0x21f   :  { %v308_v42 = vmax.f32 %v302_v37, %v307_v40 }
 0x221   :  { %v326_v43 = vpack.c.bf16 %v308_v42, %v308_v42 }
 0x223   :  { %564 = vmatmul.mubr.bf16.vlgmr.msra.gmra.mrb[4].mxu0 %v326_v43 }
 0x2f6   :  { %v415_v45 = vpop.f32.mrb[4].mxu0 }
 0x2f7   :  { %v416_v46 = vadd.f32 %v471_v44, %v415_v45  ;;  %v565_v47 = vpop.f32.mrb[5].mxu0 }
 0x2f8   :  { %v418_v48 = vpop.f32.mrb[6].mxu0 }
 0x2f9   :  { %v421_v49 = vmin.f32 %v416_v46, 20.0  ;;  %v566_v50 = vpop.f32.mrb[7].mxu0  ;;  %vm422_vm2 = vcmp.gt.f32.partialorder %v416_v46, 20.0 }
 0x2fb   :  { %v423_v51 = vmul.f32 1.442695, %v421_v49 }
 0x2fd   :  { %600 = vpow2.f32 %v423_v51 }
 0x307   :  { %v601_v52 = vpop.eup %600 }
 0x308   :  { %v425_v53 = vadd.f32 1.0, %v601_v52  ;;  %v428_v54 = vmul.f32 -0.5, %v601_v52  ;;  %v431_v56 = vand.u32 2147483647, %v601_v52 }
 0x30a   :  { %602 = vlog2.f32 %v425_v53  ;;  %v429_v55 = vadd.f32 1.0, %v428_v54  ;;  %vm432_vm1 = vcmp.lt.f32.partialorder %v431_v56, 0.0004427343 }
 0x30c   :  { %v430_v59 = vmul.f32 %v601_v52, %v429_v55 }
 0x314   :  { %v603_v57 = vpop.eup %602 }
 0x315   :  { %v427_v58 = vmul.f32 0.6931472, %v603_v57 }
 0x317   :  { %v433_v60 = vsel %vm432_vm1, %v430_v59, %v427_v58 }
 0x318   :  { %v434_v61 = vsel %vm422_vm2, %v416_v46, %v433_v60 }
 0x319   :  { %435 = vst [vmem:[#allocation10] sm:$0xff] %v434_v61 }
 0x31a   :  { %703 = shalt.err (!%p700_p8)
}
 0x31b   :  { %s704_s8 = scalar_lea.hbm %s886_s7, 128 }
 0x31c   :  { %p705_p9 = scmp.ne.s32.totalorder %s886_s7, %s704_s8  ;;  %p708_p10 = scmp.lt.u32.totalorder %s704_s8, %s886_s7 }
 0x31e   :  { %p710_p11 = pnand %p708_p10, %p705_p9 }
 0x320   :  { %713 = shalt.err (!%p710_p11)
}
 0x321   :  { %445 = dma.vmem_to_hbm [thread:$0]  %s443_s28, 128, %s886_s7, [#allocation4]  }
 0x322   :  { %720 = dma.done.wait [#allocation4], 128  }
 0x323   :  { %721 = vsyncadd [#allocation4], 4294967168 }
 0x324   :  { %449 = vsyncpa [#allocation3], 1 }
 0x325   :  { %450 = vsyncpa [#allocation6], 1 }
 0x326   :  { %451 = vsyncpa [#allocation9], 1 }
 0x327   :  { %452 = vsyncpa [#allocation4], 1 }

</bundles_post_ra>
